<compile_context>
chip_gen: v7x
topology: tpu7x:2x2x1
jax: 0.10.0
libtpu: 0.0.40
codegen_flags: <defaults>
</compile_context>

<pallas_src>
import jax
import jax.numpy as jnp
from jax.experimental import pallas as pl
from jax.experimental.pallas import tpu as pltpu


def _feature_attention_kernel(x_ref, w1_ref, b1_ref, w2_ref, b2_ref, o_ref):
    # x_ref : (TM, D) tile of flattened rows (input dtype, f32 in the demo)
    # w1_ref: (D, H) matmul dtype, b1_ref: (1, H) f32
    # w2_ref: (H, D) matmul dtype, b2_ref: (1, D) f32
    x = x_ref[...].astype(jnp.float32)

    # Grid-invariant weights/biases: constant index_map -> DMA'd once, stay resident.
    w1 = w1_ref[...]
    b1 = b1_ref[...]
    w2 = w2_ref[...]
    b2 = b2_ref[...]

    # Linear1 + tanh: (bf16-operand) MXU matmul with f32 accumulation, tanh on EUP in f32.
    h = jnp.tanh(
        jnp.dot(x.astype(w1.dtype), w1, preferred_element_type=jnp.float32) + b1
    )

    # Linear2 -> scores (MXU, f32 accumulate).
    scores = jnp.dot(h.astype(w2.dtype), w2, preferred_element_type=jnp.float32) + b2

    # Numerically-stable softmax over the feature axis (all per-row, so garbage rows
    # in a partial final block cannot affect valid rows). Reciprocal goes to the EUP
    # (approx=True -> vrcp); the division is folded into the final gating.
    m = jnp.max(scores, axis=-1, keepdims=True)
    e = jnp.exp(scores - m)
    denom = jnp.sum(e, axis=-1, keepdims=True)
    inv = pl.reciprocal(denom, approx=True)

    o_ref[...] = (x * e * inv).astype(o_ref.dtype)


def _round_up(a, m):
    return ((a + m - 1) // m) * m


def _vmem_capacity_bytes():
    """Physical VMEM of the local TPU, with a v7x-safe fallback."""
    try:
        info = pltpu.get_tpu_info()
        cap = getattr(info, "vmem_capacity_bytes", None)
        if cap:
            return int(cap)
    except Exception:
        pass
    return 64 * 1024 * 1024  # v7x-safe fallback


def _pick_tile_rows(n_rows, d, h, requested, vmem_budget_bytes):
    """Largest row-tile that fits the VMEM budget (double-buffered, f32 + bf16 copies)."""
    # Grid-invariant weights (bf16) + biases (f32); counted double-buffered to be safe.
    weight_bytes = 2 * (2 * d * h * 2 + (h + d) * 4)
    # Per row: double-buffered x-in + out tiles (f32), f32 intermediates
    # (hidden H + scores/exp 2D), bf16 matmul copies of x and h.
    per_row_bytes = (2 * d * 4) + (2 * d * 4) + (h + 2 * d) * 4 + (d + h) * 2
    budget_rows = max(8, (vmem_budget_bytes - weight_bytes) // max(per_row_bytes, 1))
    tm = min(requested, budget_rows)
    tm = min(tm, _round_up(n_rows, 8))      # don't over-tile tiny problems
    tm = max(8, (tm // 8) * 8)              # sublane multiple for f32
    return int(tm)


def feature_attention(x, w1, b1, w2, b2, *, tile_rows=8192,
                      matmul_dtype=jnp.bfloat16):
    """x: (B, S, D) float32. w1: (D, H), b1: (H,), w2: (H, D), b2: (D,)."""
    B, S, D = x.shape
    H = w1.shape[1]
    N = B * S

    vmem_cap = _vmem_capacity_bytes()
    vmem_limit = int(vmem_cap * 3 // 4)            # ~48 MiB on v7x, ~96 MiB on v5e/v6e
    tile_budget = int(vmem_limit * 0.8)            # headroom for compiler scratch
    tm = _pick_tile_rows(N, D, H, tile_rows, tile_budget)

    # Free reshape (no HBM copy); no padding and no output slice round-trips.
    x2d = x.reshape(N, D)

    # bf16 matmul operands (MXU fast path, halves weight traffic) with f32 accumulate;
    # biases / elementwise math stay in f32 (v5e-safe).
    w1_mm = w1.astype(matmul_dtype)
    w2_mm = w2.astype(matmul_dtype)
    b1_2d = b1.reshape(1, H).astype(jnp.float32)
    b2_2d = b2.reshape(1, D).astype(jnp.float32)

    grid = (pl.cdiv(N, tm),)

    itemsize = jnp.dtype(matmul_dtype).itemsize
    cost = pl.CostEstimate(
        flops=4 * N * D * H,                                    # two matmuls
        transcendentals=N * (H + D),                            # tanh + exp
        bytes_accessed=(2 * N * D + H + D) * 4 + 2 * D * H * itemsize,
    )

    out2d = pl.pallas_call(
        _feature_attention_kernel,
        out_shape=jax.ShapeDtypeStruct((N, D), x.dtype),
        grid_spec=pltpu.PrefetchScalarGridSpec(
            num_scalar_prefetch=0,
            grid=grid,
            in_specs=[
                pl.BlockSpec((tm, D), lambda i: (i, 0)),  # x tile (streams)
                pl.BlockSpec((D, H), lambda i: (0, 0)),   # w1 (grid-invariant)
                pl.BlockSpec((1, H), lambda i: (0, 0)),   # b1
                pl.BlockSpec((H, D), lambda i: (0, 0)),   # w2 (grid-invariant)
                pl.BlockSpec((1, D), lambda i: (0, 0)),   # b2
            ],
            out_specs=pl.BlockSpec((tm, D), lambda i: (i, 0)),
        ),
        compiler_params=pltpu.CompilerParams(
            dimension_semantics=("parallel",),   # rows are independent
            vmem_limit_bytes=vmem_limit,
        ),
        cost_estimate=cost,
    )(x2d, w1_mm, b1_2d, w2_mm, b2_2d)

    return out2d.reshape(B, S, D)


def _reference(x, w1, b1, w2, b2):
    # Pure-JAX reference matching the PyTorch forward.
    h = jnp.tanh(x @ w1 + b1)
    scores = h @ w2 + b2
    attn = jax.nn.softmax(scores, axis=-1)
    return x * attn


if __name__ == "__main__":
    # Small shapes consistent with the module: batch=2, seq=8, d_model=32, hidden=64.
    B, S, D, H = 2, 8, 32, 64

    key = jax.random.PRNGKey(0)
    kx, kw1, kb1, kw2, kb2 = jax.random.split(key, 5)

    x = jax.random.normal(kx, (B, S, D), dtype=jnp.float32)
    # PyTorch Linear weights stored transposed for x @ W convention:
    # W1: (H, D) -> (D, H); W2: (D, H) -> (H, D).
    w1 = jax.random.normal(kw1, (D, H), dtype=jnp.float32) * (1.0 / jnp.sqrt(D))
    b1 = jax.random.normal(kb1, (H,), dtype=jnp.float32) * 0.01
    w2 = jax.random.normal(kw2, (H, D), dtype=jnp.float32) * (1.0 / jnp.sqrt(H))
    b2 = jax.random.normal(kb2, (D,), dtype=jnp.float32) * 0.01

    ref = _reference(x, w1, b1, w2, b2)

    # Exact-precision path (f32 matmul operands): tight check of the kernel math.
    out_f32 = feature_attention(x, w1, b1, w2, b2, matmul_dtype=jnp.float32)
    out_f32 = jax.block_until_ready(out_f32)
    assert out_f32.shape == (B, S, D)
    # Tolerance relaxed slightly for pl.reciprocal(approx=True) in the softmax.
    assert jnp.allclose(out_f32, ref, atol=2e-3, rtol=2e-3), "f32 path mismatch"

    # Default fast path (bf16 matmul operands, f32 accumulate): looser smoke check.
    out_bf = feature_attention(x, w1, b1, w2, b2)
    out_bf = jax.block_until_ready(out_bf)
    assert out_bf.shape == (B, S, D)
    assert jnp.allclose(out_bf, ref, atol=5e-2, rtol=5e-2), "bf16 path mismatch"

    print("KERNEL_OK")
</pallas_src>

<mosaic_0001>
module attributes {stable_mosaic.version = 11 : i64} {
  func.func @_feature_attention_kernel(%arg0: i32, %arg1: memref<16x32xf32, #tpu.memory_space<vmem>>, %arg2: memref<32x64xf32, #tpu.memory_space<vmem>>, %arg3: memref<1x64xf32, #tpu.memory_space<vmem>>, %arg4: memref<64x32xf32, #tpu.memory_space<vmem>>, %arg5: memref<1x32xf32, #tpu.memory_space<vmem>>, %arg6: memref<16x32xf32, #tpu.memory_space<vmem>>) attributes {dimension_semantics = [#tpu.dimension_semantics<parallel>], iteration_bounds = array<i64: 1>, scalar_prefetch = 0 : i64, scratch_operands = 0 : i64, tpu.core_type = #tpu.core_type<tc>, window_params = [{transform_indices = @transform_0, window_bounds = array<i64: 16, 32>}, {pipeline_mode = #tpu.pipeline_mode<synchronous>, transform_indices = @transform_1, window_bounds = array<i64: 32, 64>}, {pipeline_mode = #tpu.pipeline_mode<synchronous>, transform_indices = @transform_2, window_bounds = array<i64: 1, 64>}, {pipeline_mode = #tpu.pipeline_mode<synchronous>, transform_indices = @transform_3, window_bounds = array<i64: 64, 32>}, {pipeline_mode = #tpu.pipeline_mode<synchronous>, transform_indices = @transform_4, window_bounds = array<i64: 1, 32>}, {transform_indices = @transform_5, window_bounds = array<i64: 16, 32>}]} {
    %c0 = arith.constant 0 : index
    %c0_0 = arith.constant 0 : index
    %0 = vector.load %arg1[%c0, %c0_0] : memref<16x32xf32, #tpu.memory_space<vmem>>, vector<16x32xf32>
    %c0_1 = arith.constant 0 : index
    %c0_2 = arith.constant 0 : index
    %1 = vector.load %arg2[%c0_1, %c0_2] : memref<32x64xf32, #tpu.memory_space<vmem>>, vector<32x64xf32>
    %c0_3 = arith.constant 0 : index
    %c0_4 = arith.constant 0 : index
    %2 = vector.load %arg3[%c0_3, %c0_4] : memref<1x64xf32, #tpu.memory_space<vmem>>, vector<1x64xf32>
    %c0_5 = arith.constant 0 : index
    %c0_6 = arith.constant 0 : index
    %3 = vector.load %arg4[%c0_5, %c0_6] : memref<64x32xf32, #tpu.memory_space<vmem>>, vector<64x32xf32>
    %c0_7 = arith.constant 0 : index
    %c0_8 = arith.constant 0 : index
    %4 = vector.load %arg5[%c0_7, %c0_8] : memref<1x32xf32, #tpu.memory_space<vmem>>, vector<1x32xf32>
    %cst = arith.constant dense<0.000000e+00> : vector<16x64xf32>
    %5 = tpu.matmul %0, %1, %cst {dimension_numbers = #tpu.dot_dimension_numbers<[1], [0], [0], [1], [0, 0, 1, 1], [], []>} : vector<16x32xf32>, vector<32x64xf32>, vector<16x64xf32> -> vector<16x64xf32>
    %6 = vector.broadcast %2 : vector<1x64xf32> to vector<16x64xf32>
    %7 = arith.addf %5, %6 : vector<16x64xf32>
    %8 = math.tanh %7 : vector<16x64xf32>
    %cst_9 = arith.constant dense<0.000000e+00> : vector<16x32xf32>
    %9 = tpu.matmul %8, %3, %cst_9 {dimension_numbers = #tpu.dot_dimension_numbers<[1], [0], [0], [1], [0, 0, 1, 1], [], []>} : vector<16x64xf32>, vector<64x32xf32>, vector<16x32xf32> -> vector<16x32xf32>
    %10 = vector.broadcast %4 : vector<1x32xf32> to vector<16x32xf32>
    %11 = arith.addf %9, %10 : vector<16x32xf32>
    %cst_10 = arith.constant dense<0xFF800000> : vector<16xf32>
    %12 = vector.multi_reduction <maximumf>, %11, %cst_10 [1] : vector<16x32xf32> to vector<16xf32>
    %13 = vector.shape_cast %12 : vector<16xf32> to vector<16x1xf32>
    %14 = vector.broadcast %13 : vector<16x1xf32> to vector<16x32xf32>
    %15 = arith.subf %11, %14 : vector<16x32xf32>
    %16 = math.exp %15 : vector<16x32xf32>
    %cst_11 = arith.constant dense<0.000000e+00> : vector<16xf32>
    %17 = vector.multi_reduction <add>, %16, %cst_11 [1] : vector<16x32xf32> to vector<16xf32>
    %18 = vector.shape_cast %17 : vector<16xf32> to vector<16x1xf32>
    %19 = tpu.reciprocal %18 {approx = true} : vector<16x1xf32> -> vector<16x1xf32>
    %20 = arith.mulf %0, %16 : vector<16x32xf32>
    %21 = vector.broadcast %19 : vector<16x1xf32> to vector<16x32xf32>
    %22 = arith.mulf %20, %21 : vector<16x32xf32>
    %c0_12 = arith.constant 0 : index
    %c0_13 = arith.constant 0 : index
    %23 = vector.load %arg6[%c0_12, %c0_13] : memref<16x32xf32, #tpu.memory_space<vmem>>, vector<16x32xf32>
    tpu.vector_store %arg6[%c0_12, %c0_13], %22 {strides = array<i32>} : memref<16x32xf32, #tpu.memory_space<vmem>>, vector<16x32xf32>,
    return
  }
  func.func @transform_0(%arg0: i32) -> (i32, i32) {
    %c0_i32 = arith.constant 0 : i32
    %c0_i32_0 = arith.constant 0 : i32
    return %arg0, %c0_i32 : i32, i32
  }
  func.func @transform_1(%arg0: i32) -> (i32, i32) {
    %c0_i32 = arith.constant 0 : i32
    %c0_i32_0 = arith.constant 0 : i32
    %c0_i32_1 = arith.constant 0 : i32
    return %c0_i32, %c0_i32_0 : i32, i32
  }
  func.func @transform_2(%arg0: i32) -> (i32, i32) {
    %c0_i32 = arith.constant 0 : i32
    %c0_i32_0 = arith.constant 0 : i32
    %c0_i32_1 = arith.constant 0 : i32
    return %c0_i32, %c0_i32_0 : i32, i32
  }
  func.func @transform_3(%arg0: i32) -> (i32, i32) {
    %c0_i32 = arith.constant 0 : i32
    %c0_i32_0 = arith.constant 0 : i32
    %c0_i32_1 = arith.constant 0 : i32
    return %c0_i32, %c0_i32_0 : i32, i32
  }
  func.func @transform_4(%arg0: i32) -> (i32, i32) {
    %c0_i32 = arith.constant 0 : i32
    %c0_i32_0 = arith.constant 0 : i32
    %c0_i32_1 = arith.constant 0 : i32
    return %c0_i32, %c0_i32_0 : i32, i32
  }
  func.func @transform_5(%arg0: i32) -> (i32, i32) {
    %c0_i32 = arith.constant 0 : i32
    %c0_i32_0 = arith.constant 0 : i32
    return %arg0, %c0_i32 : i32, i32
  }
}

</mosaic_0001>

<bundles_post_ra>
// kernel: tpu_custom_call.1
= control target key start
LH: loop header
LB: loop body
LE: loop exit
PB: predicated region body
PF: predicated region fallthrough
CT: control target
= control target key end

     0   :  { %vm43_vm0 = vcmask 261120   ;;  %s481_s0 = inlined_call_operand.vmem [shape: f32[16,32], index: 0, kind: input, shape index: {}]   ;;  %s482_s1 = inlined_call_operand.vmem [shape: f32[32,64], index: 1, kind: input, shape index: {}]   ;;  %s483_s2 = inlined_call_operand.vmem [shape: f32[1,64], index: 2, kind: input, shape index: {}]   ;;  %s484_s3 = inlined_call_operand.vmem [shape: f32[64,32], index: 3, kind: input, shape index: {}]   ;;  %s485_s4 = inlined_call_operand.vmem [shape: f32[1,32], index: 4, kind: input, shape index: {}]   ;;  %s486_s5 = inlined_call_operand.hbm [shape: f32[16,32], index: 5, kind: output, shape index: {}]  }
   0x1   :  { %v23_v0 = vld [vmem:[%s482_s1] sm:$0xff]  ;;  %v24_v1 = vld [vmem:[%s482_s1 + $0x8] sm:$0xff]  ;;  %v25_v2 = vld [vmem:[%s482_s1 + $0x10] sm:$0xff] }
   0x2   :  { %v309_v3 = vpack.c.bf16 %v24_v1, %v23_v0  ;;  %v26_v4 = vld [vmem:[%s482_s1 + $0x18] sm:$0xff]  ;;  %v420_v5 = vld [vmem:[%s481_s0] sm:$0xff] }
   0x3   :  { %v313_v6 = vpack.c.bf16 %v26_v4, %v25_v2  ;;  %287 = vmatprep.mubr.msk.f32.mxu0 %vm43_vm0, %v420_v5 }
   0x4   :  { %10 = vsyncpa [#allocation3], 0  ;;  %310 = vmatprep.subr.bf16.mxu0 %v309_v3  ;;  %v427_v7 = vld [vmem:[%s481_s0 + $0x8] sm:$0xff]  ;;  %v28_v8 = vld [vmem:[%s484_s3] sm:$0xff]  ;;  %vm133_vm1 = vcmask 523264  }
   0x5   :  { %312 = vmatpush3.bf16.msra.mxu0 %v309_v3  ;;  %v29_v9 = vld [vmem:[%s484_s3 + $0x8] sm:$0xff]  ;;  %v30_v11 = vld [vmem:[%s484_s3 + $0x10] sm:$0xff]  ;;  %v31_v12 = vld [vmem:[%s484_s3 + $0x18] sm:$0xff] }
   0x6   :  { %314 = vmatprep.subr.bf16.mxu0 %v313_v6  ;;  %v317_v10 = vpack.c.bf16 %v29_v9, %v28_v8  ;;  %v321_v13 = vpack.c.bf16 %v31_v12, %v30_v11  ;;  %v32_v14 = vld [vmem:[%s484_s3 + $0x20] sm:$0xff]  ;;  %v33_v15 = vld [vmem:[%s484_s3 + $0x28] sm:$0xff]  ;;  %v34_v16 = vld [vmem:[%s484_s3 + $0x30] sm:$0xff] }
   0x7   :  { %v325_v17 = vpack.c.bf16 %v33_v15, %v32_v14  ;;  %v35_v18 = vld [vmem:[%s484_s3 + $0x38] sm:$0xff]  ;;  %v257_v20 = vld [vmem:[%s483_s2] ss:$0 sm:$0xff]  ;;  %s372_s2 = smov [#allocation2]  }
   0x8   :  { %318 = vmatprep.subr.bf16.mxu1 %v317_v10  ;;  %v329_v19 = vpack.c.bf16 %v35_v18, %v34_v16  ;;  %v260_v27 = vld [vmem:[%s485_s4] ss:$0 sm:$0xff]  ;;  %s246_s4 = sshll.u32 %s372_s2, 4  ;;  %s247_s4 = int_to_ptr.vmem [resolvable:$true] %s246_s4 }
   0x9   :  { %316 = vmatpush3.bf16.msra.mxu0 %v313_v6  ;;  %320 = vmatpush3.bf16.msra.mxu1 %v317_v10  ;;  %s348_s22 = scalar_lea.vmem %s247_s4, 256  ;;  %p353_p1 = scmp.lt.s32.totalorder %s247_s4, %s247_s4 }
   0xa   :  { %322 = vmatprep.subr.bf16.mxu1 %v321_v13  ;;  %p349_p0 = scmp.ne.s32.totalorder %s247_s4, %s348_s22  ;;  %p354_p2 = scmp.lt.s32.totalorder %s348_s22, %s348_s22 }
   0xc   :  { %288 = vmatmul.mubr.msk.f32.vlgmr.msra.gmra.mrb[0].mxu0 %vm43_vm0, %v427_v7  ;;  %p355_p3 = por %p354_p2, %p353_p1 }
   0xd   :  { %324 = vmatpush3.bf16.msra.mxu1 %v321_v13 }
   0xe   :  { %326 = vmatprep.subr.bf16.mxu1 %v325_v17  ;;  %p356_p4 = pnand %p355_p3, %p349_p0 }
  0x11   :  { %328 = vmatpush3.bf16.msra.mxu1 %v325_v17 }
  0x12   :  { %330 = vmatprep.subr.bf16.mxu1 %v329_v19 }
  0x15   :  { %332 = vmatpush3.bf16.msra.mxu1 %v329_v19 }
  0xdf   :  { %v289_v21 = vpop.f32.mrb[0].mxu0 }
  0xe0   :  { %v122_v22 = vadd.f32 %v289_v21, %v257_v20  ;;  %v116_v23 = vpop.f32.mrb[1].mxu0 }
  0xe1   :  { %v117_v24 = vadd.f32 %v257_v20, %v116_v23 }
  0xe3   :  { %336 = vtanh.f32 %v117_v24 }
  0xe4   :  { %338 = vtanh.f32 %v122_v22 }
  0xed   :  { %v337_v25 = vpop.eup %336 }
  0xee   :  { %v339_v26 = vpop.eup %338  ;;  %306 = vmatprep.mubr.msk.f32.mxu1 %vm133_vm1, %v337_v25 }
  0xef   :  { %307 = vmatmul.mubr.msk.f32.vlgmr.msra.gmra.mrb[0].mxu1 %vm133_vm1, %v339_v26 }
 0x1c2   :  { %v308_v28 = vpop.f32.mrb[0].mxu1 }
 0x1c3   :  { %v206_v29 = vpop.f32.mrb[1].mxu1  ;;  %v212_v31 = vadd.f32 %v308_v28, %v260_v27 }
 0x1c4   :  { %v207_v30 = vadd.f32 %v260_v27, %v206_v29 }
 0x1c5   :  { %v218_v33 = vsel %vm43_vm0, %v212_v31, -inf }
 0x1c6   :  { %v215_v32 = vsel %vm43_vm0, %v207_v30, -inf }
 0x1c7   :  { %216 = vmax.xlane.f32.xlu0 %v215_v32 }
 0x1cb   :  { %219 = vmax.xlane.f32.xlu0 %v218_v33 }
 0x254   :  { %v217_v34 = vpop.xlane.xlu0 %216 }
 0x255   :  { %v221_v35 = vsub.f32 %v207_v30, %v217_v34 }
 0x257   :  { %v223_v36 = vmul.f32 1.442695, %v221_v35 }
 0x258   :  { %v220_v37 = vpop.xlane.xlu0 %219 }
 0x259   :  { %340 = vpow2.f32 %v223_v36  ;;  %v222_v38 = vsub.f32 %v212_v31, %v220_v37 }
 0x25b   :  { %v225_v39 = vmul.f32 1.442695, %v222_v38 }
 0x25d   :  { %342 = vpow2.f32 %v225_v39 }
 0x263   :  { %v341_v40 = vpop.eup %340 }
 0x264   :  { %v227_v41 = vsel %vm43_vm0, %v341_v40, 0.0  ;;  %v235_v46 = vmul.f32 %v341_v40, %v420_v5 }
 0x265   :  { %228 = vadd.xlane.f32.xlu1 %v227_v41 }
 0x267   :  { %v343_v42 = vpop.eup %342 }
 0x268   :  { %v230_v43 = vsel %vm43_vm0, %v343_v42, 0.0  ;;  %v236_v49 = vmul.f32 %v343_v42, %v427_v7 }
 0x269   :  { %231 = vadd.xlane.f32.xlu1 %v230_v43 }
 0x2f2   :  { %v229_v44 = vpop.xlane.xlu1 %228 }
 0x2f3   :  { %344 = vrcp.f32 %v229_v44 }
 0x2f6   :  { %v232_v45 = vpop.xlane.xlu1 %231 }
 0x2f7   :  { %346 = vrcp.f32 %v232_v45 }
 0x2fd   :  { %v345_v47 = vpop.eup %344 }
 0x2fe   :  { %v237_v48 = vmul.f32 %v345_v47, %v235_v46 }
 0x300   :  { %239 = vst.msk [vmem:[#allocation2] sm:$0xff] %vm43_vm0, %v237_v48 }
 0x301   :  { %v347_v50 = vpop.eup %346 }
 0x302   :  { %v238_v51 = vmul.f32 %v347_v50, %v236_v49 }
 0x304   :  { %240 = vst.msk [vmem:[#allocation2 + $0x8] sm:$0xff] %vm43_vm0, %v238_v51 }
 0x305   :  { %359 = shalt.err (!%p356_p4)
}
 0x306   :  { %s360_s25 = scalar_lea.hbm %s486_s5, 256 }
 0x307   :  { %p361_p5 = scmp.ne.s32.totalorder %s486_s5, %s360_s25  ;;  %p364_p6 = scmp.lt.u32.totalorder %s360_s25, %s486_s5 }
 0x309   :  { %p366_p7 = pnand %p364_p6, %p361_p5 }
 0x30b   :  { %369 = shalt.err (!%p366_p7)
}
 0x30c   :  { %s373_s1 = smov 128   ;;  %s374_s30 = smov 8  }
 0x30d   :  { %252 = dma.vmem_to_hbm [thread:$0]  %s247_s4, 256, %s486_s5, [#allocation3], %s373_s1, %s373_s1, %s374_s30  }
 0x30e   :  { %370 = dma.done.wait [#allocation3], 256  }
 0x30f   :  { %371 = vsyncadd [#allocation3], 4294967040 }
 0x310   :  { %256 = vsyncpa [#allocation3], 1 }

</bundles_post_ra>
